<compile_context>
chip_gen: v7x
topology: tpu7x:2x2x1
jax: 0.10.0
libtpu: 0.0.40
codegen_flags: <defaults>
</compile_context>

<pallas_src>
import jax
import jax.numpy as jnp
import numpy as np
from jax.experimental import pallas as pl
from jax.experimental.pallas import tpu as pltpu

# ---- model hyper-parameters (small, consistent with the module) -------------
B = 2          # batch
T = 8          # sequence length
D = 32         # encoder_dim
F = 64         # predictor_filter_size
K = 3          # predictor_kernel_size (padding=1 -> "same" length for K=3)
PAD = 1
BT = B * T
EPS = 1e-5     # nn.LayerNorm default eps
# dropout is inactive at inference time (identity)

# NOTE on real checkpoints: PyTorch nn.Conv1d stores weight as (F_out, C_in, K);
# this kernel expects (K, C_in, F_out), i.e. w_torch.permute(2, 1, 0).  nn.Linear
# stores (1, F); this kernel expects the (F, 1) column, i.e. w_torch.T.


def predictor_kernel(x_ref, w1_ref, w2_ref, vec_ref, out_ref):
    """Single grid step; the whole (tiny) problem is resident in VMEM.

    x_ref   : (B*T, D)    batch folded into the sublane axis
    w1_ref  : (K*D, F)    conv1 taps stacked along the contraction dim (im2col order)
    w2_ref  : (K*F, F)    conv2 taps, same layout
    vec_ref : (8, F)      rows: b1, g1, be1, b2, g2, be2, wl (as a row), bl (broadcast)
    out_ref : (1, B*T)    lane-dense output row
    """
    vecs = vec_ref[...]
    b1, g1, be1 = vecs[0:1, :], vecs[1:2, :], vecs[2:3, :]
    b2, g2, be2 = vecs[3:4, :], vecs[4:5, :], vecs[5:6, :]
    wl_row = vecs[6:7, :]          # (1, F)
    bl = vecs[7:8, 0:1]            # (1, 1)

    def taps(v):
        # Zero-padded +/-1 time shifts (masked so they never cross the folded batch
        # boundary), lane-concatenated into the im2col matrix (B*T, K*C).
        t = jax.lax.broadcasted_iota(jnp.int32, v.shape, 0) % T
        prev = jnp.where(t == 0, 0.0, pltpu.roll(v, shift=1, axis=0))
        nxt = jnp.where(t == T - 1, 0.0, pltpu.roll(v, shift=BT - 1, axis=0))
        return jnp.concatenate([prev, v, nxt], axis=-1)

    def ln_relu(v, g, be):
        mu = jnp.mean(v, axis=-1, keepdims=True)
        var = jnp.mean(jnp.square(v - mu), axis=-1, keepdims=True)
        return jnp.maximum((v - mu) * jax.lax.rsqrt(var + EPS) * g + be, 0.0)

    x = x_ref[...]                                            # (B*T, D)

    # ---- Conv1d #1 (one im2col matmul) + LayerNorm + ReLU --------------------
    h = jnp.dot(taps(x), w1_ref[...],
                preferred_element_type=jnp.float32) + b1      # (B*T, F)
    h = ln_relu(h, g1, be1)

    # ---- Conv1d #2 (one im2col matmul) + LayerNorm + ReLU --------------------
    h2 = jnp.dot(taps(h), w2_ref[...],
                 preferred_element_type=jnp.float32) + b2     # (B*T, F)
    h2 = ln_relu(h2, g2, be2)

    # ---- Linear(F -> 1) + ReLU, emitted as a lane-dense (1, B*T) row ---------
    # (1,F) contracted against (B*T,F) on the F axis -> (1, B*T): the result is
    # produced directly in lane-major layout, so the store is one dense row
    # instead of B*T width-1 masked stores.
    o = jax.lax.dot_general(wl_row, h2, (((1,), (1,)), ((), ())),
                            preferred_element_type=jnp.float32)
    out_ref[...] = jnp.maximum(o + bl, 0.0)


def predictor_forward(x, params):
    """x: (B, T, D) float32.  Returns eval-mode output (1, B, T)."""
    (w1, b1, g1, be1, w2, b2, g2, be2, wl, bl) = params

    # Layout plumbing (free, outside the kernel):
    x2d = x.reshape(BT, D)                                    # fold batch into rows
    w1c = w1.reshape(K * D, F)                                # im2col weight layout
    w2c = w2.reshape(K * F, F)
    vecs = jnp.concatenate(
        [b1, g1, be1, b2, g2, be2, wl.T, jnp.broadcast_to(bl, (1, F))], axis=0)

    out = pl.pallas_call(
        predictor_kernel,
        out_shape=jax.ShapeDtypeStruct((1, BT), jnp.float32),
        grid_spec=pltpu.PrefetchScalarGridSpec(
            num_scalar_prefetch=0,
            grid=(1,),                                        # single fused step
            in_specs=[
                pl.BlockSpec((BT, D), lambda i: (0, 0)),      # x (batch folded)
                pl.BlockSpec((K * D, F), lambda i: (0, 0)),   # conv1 weight
                pl.BlockSpec((K * F, F), lambda i: (0, 0)),   # conv2 weight
                pl.BlockSpec((8, F), lambda i: (0, 0)),       # packed small vectors
            ],
            out_specs=pl.BlockSpec((1, BT), lambda i: (0, 0)),
        ),
        compiler_params=pltpu.CompilerParams(
            dimension_semantics=("arbitrary",)),
    )(x2d, w1c, w2c, vecs)

    # PyTorch eval path: out.squeeze() then out.unsqueeze(0) -> (1, B, T)
    return out.reshape(1, B, T)


def reference_forward(x, params):
    """Plain-JAX reference with identical math (for validation)."""
    (w1, b1, g1, be1, w2, b2, g2, be2, wl, bl) = params
    hi = jax.lax.Precision.HIGHEST

    def conv(h, w, b):
        hp = jnp.pad(h, ((0, 0), (PAD, PAD), (0, 0)))
        acc = jnp.zeros(h.shape[:2] + (w.shape[-1],), jnp.float32)
        for k in range(K):
            acc = acc + jnp.einsum('btd,df->btf', hp[:, k:k + T, :], w[k],
                                   precision=hi)
        return acc + b

    def ln_relu(h, g, be):
        mu = jnp.mean(h, -1, keepdims=True)
        var = jnp.mean(jnp.square(h - mu), -1, keepdims=True)
        return jnp.maximum((h - mu) * jax.lax.rsqrt(var + EPS) * g + be, 0.0)

    h = ln_relu(conv(x, w1, b1), g1, be1)
    h = ln_relu(conv(h, w2, b2), g2, be2)
    o = jnp.maximum(jnp.einsum('btf,fo->bto', h, wl, precision=hi) + bl, 0.0)
    return jnp.squeeze(o)[None, ...]


def init_params(key):
    ks = jax.random.split(key, 10)
    w1 = 0.1 * jax.random.normal(ks[0], (K, D, F), jnp.float32)
    b1 = 0.1 * jax.random.normal(ks[1], (1, F), jnp.float32)
    g1 = 1.0 + 0.05 * jax.random.normal(ks[2], (1, F), jnp.float32)
    be1 = 0.05 * jax.random.normal(ks[3], (1, F), jnp.float32)
    w2 = 0.1 * jax.random.normal(ks[4], (K, F, F), jnp.float32)
    b2 = 0.1 * jax.random.normal(ks[5], (1, F), jnp.float32)
    g2 = 1.0 + 0.05 * jax.random.normal(ks[6], (1, F), jnp.float32)
    be2 = 0.05 * jax.random.normal(ks[7], (1, F), jnp.float32)
    wl = 0.1 * jax.random.normal(ks[8], (F, 1), jnp.float32)
    bl = 0.1 * jax.random.normal(ks[9], (1, 1), jnp.float32)
    return (w1, b1, g1, be1, w2, b2, g2, be2, wl, bl)


if __name__ == "__main__":
    key = jax.random.PRNGKey(0)
    pkey, xkey = jax.random.split(key)
    params = init_params(pkey)
    x = jax.random.normal(xkey, (B, T, D), jnp.float32)

    out = jax.block_until_ready(predictor_forward(x, params))
    ref = jax.block_until_ready(reference_forward(x, params))

    assert out.shape == (1, B, T), out.shape
    np.testing.assert_allclose(np.asarray(out), np.asarray(ref),
                               rtol=1e-5, atol=2e-5)
    print("KERNEL_OK")
</pallas_src>

<mosaic_0001>
module attributes {stable_mosaic.version = 11 : i64} {
  func.func @predictor_kernel(%arg0: i32, %arg1: memref<16x32xf32, #tpu.memory_space<vmem>>, %arg2: memref<96x64xf32, #tpu.memory_space<vmem>>, %arg3: memref<192x64xf32, #tpu.memory_space<vmem>>, %arg4: memref<8x64xf32, #tpu.memory_space<vmem>>, %arg5: memref<1x16xf32, #tpu.memory_space<vmem>>) attributes {dimension_semantics = [#tpu.dimension_semantics<arbitrary>], iteration_bounds = array<i64: 1>, scalar_prefetch = 0 : i64, scratch_operands = 0 : i64, tpu.core_type = #tpu.core_type<tc>, window_params = [{pipeline_mode = #tpu.pipeline_mode<synchronous>, transform_indices = @transform_0, window_bounds = array<i64: 16, 32>}, {pipeline_mode = #tpu.pipeline_mode<synchronous>, transform_indices = @transform_1, window_bounds = array<i64: 96, 64>}, {pipeline_mode = #tpu.pipeline_mode<synchronous>, transform_indices = @transform_2, window_bounds = array<i64: 192, 64>}, {pipeline_mode = #tpu.pipeline_mode<synchronous>, transform_indices = @transform_3, window_bounds = array<i64: 8, 64>}, {pipeline_mode = #tpu.pipeline_mode<synchronous>, transform_indices = @transform_4, window_bounds = array<i64: 1, 16>}]} {
    %c0 = arith.constant 0 : index
    %c0_0 = arith.constant 0 : index
    %0 = vector.load %arg4[%c0, %c0_0] : memref<8x64xf32, #tpu.memory_space<vmem>>, vector<8x64xf32>
    %1 = vector.extract_strided_slice %0 {offsets = [0, 0], sizes = [1, 64], strides = [1, 1]} : vector<8x64xf32> to vector<1x64xf32>
    %2 = vector.extract_strided_slice %0 {offsets = [1, 0], sizes = [1, 64], strides = [1, 1]} : vector<8x64xf32> to vector<1x64xf32>
    %3 = vector.extract_strided_slice %0 {offsets = [2, 0], sizes = [1, 64], strides = [1, 1]} : vector<8x64xf32> to vector<1x64xf32>
    %4 = vector.extract_strided_slice %0 {offsets = [3, 0], sizes = [1, 64], strides = [1, 1]} : vector<8x64xf32> to vector<1x64xf32>
    %5 = vector.extract_strided_slice %0 {offsets = [4, 0], sizes = [1, 64], strides = [1, 1]} : vector<8x64xf32> to vector<1x64xf32>
    %6 = vector.extract_strided_slice %0 {offsets = [5, 0], sizes = [1, 64], strides = [1, 1]} : vector<8x64xf32> to vector<1x64xf32>
    %7 = vector.extract_strided_slice %0 {offsets = [6, 0], sizes = [1, 64], strides = [1, 1]} : vector<8x64xf32> to vector<1x64xf32>
    %8 = vector.extract_strided_slice %0 {offsets = [7, 0], sizes = [1, 1], strides = [1, 1]} : vector<8x64xf32> to vector<1x1xf32>
    %c0_1 = arith.constant 0 : index
    %c0_2 = arith.constant 0 : index
    %9 = vector.load %arg1[%c0_1, %c0_2] : memref<16x32xf32, #tpu.memory_space<vmem>>, vector<16x32xf32>
    %10 = tpu.iota {dimensions = array<i32: 0>} : vector<16x32xi32>
    %c8_i32 = arith.constant 8 : i32
    %c0_i32 = arith.constant 0 : i32
    %11 = arith.cmpi eq, %c8_i32, %c0_i32 : i32
    %c1_i32 = arith.constant 1 : i32
    %12 = arith.select %11, %c1_i32, %c8_i32 : i32
    %13 = vector.broadcast %12 : i32 to vector<16x32xi32>
    %14 = arith.remsi %10, %13 : vector<16x32xi32>
    %c0_i32_3 = arith.constant 0 : i32
    %15 = vector.broadcast %c0_i32_3 : i32 to vector<16x32xi32>
    %16 = arith.cmpi ne, %14, %15 : vector<16x32xi32>
    %c0_i32_4 = arith.constant 0 : i32
    %17 = vector.broadcast %c0_i32_4 : i32 to vector<16x32xi32>
    %18 = arith.cmpi slt, %14, %17 : vector<16x32xi32>
    %c0_i32_5 = arith.constant 0 : i32
    %19 = arith.cmpi slt, %12, %c0_i32_5 : i32
    %20 = vector.broadcast %19 : i1 to vector<16x32xi1>
    %21 = vector.broadcast %20 : vector<16x32xi1> to vector<16x32xi1>
    %22 = arith.xori %18, %21 : vector<16x32xi1>
    %23 = arith.andi %22, %16 : vector<16x32xi1>
    %24 = vector.broadcast %12 : i32 to vector<16x32xi32>
    %25 = arith.addi %14, %24 : vector<16x32xi32>
    %26 = arith.select %23, %25, %14 : vector<16x32xi1>, vector<16x32xi32>
    %c0_i32_6 = arith.constant 0 : i32
    %27 = vector.broadcast %c0_i32_6 : i32 to vector<16x32xi32>
    %28 = arith.cmpi eq, %26, %27 : vector<16x32xi32>
    %c1_i32_7 = arith.constant 1 : i32
    %29 = tpu.dynamic_rotate %9 by %c1_i32_7 dim 0 : vector<16x32xf32>, i32 -> vector<16x32xf32>
    %cst = arith.constant 0.000000e+00 : f32
    %30 = vector.broadcast %cst : f32 to vector<16x32xf32>
    %31 = arith.select %28, %30, %29 : vector<16x32xi1>, vector<16x32xf32>
    %c7_i32 = arith.constant 7 : i32
    %32 = vector.broadcast %c7_i32 : i32 to vector<16x32xi32>
    %33 = arith.cmpi eq, %26, %32 : vector<16x32xi32>
    %c15_i32 = arith.constant 15 : i32
    %34 = tpu.dynamic_rotate %9 by %c15_i32 dim 0 : vector<16x32xf32>, i32 -> vector<16x32xf32>
    %cst_8 = arith.constant 0.000000e+00 : f32
    %35 = vector.broadcast %cst_8 : f32 to vector<16x32xf32>
    %36 = arith.select %33, %35, %34 : vector<16x32xi1>, vector<16x32xf32>
    %37 = tpu.concatenate %31, %9, %36 in 1 : vector<16x32xf32>, vector<16x32xf32>, vector<16x32xf32> -> vector<16x96xf32>
    %c0_9 = arith.constant 0 : index
    %c0_10 = arith.constant 0 : index
    %38 = vector.load %arg2[%c0_9, %c0_10] : memref<96x64xf32, #tpu.memory_space<vmem>>, vector<96x64xf32>
    %cst_11 = arith.constant dense<0.000000e+00> : vector<16x64xf32>
    %39 = tpu.matmul %37, %38, %cst_11 {dimension_numbers = #tpu.dot_dimension_numbers<[1], [0], [0], [1], [0, 0, 1, 1], [], []>} : vector<16x96xf32>, vector<96x64xf32>, vector<16x64xf32> -> vector<16x64xf32>
    %40 = vector.broadcast %1 : vector<1x64xf32> to vector<16x64xf32>
    %41 = arith.addf %39, %40 : vector<16x64xf32>
    %cst_12 = arith.constant dense<0.000000e+00> : vector<16xf32>
    %42 = vector.multi_reduction <add>, %41, %cst_12 [1] : vector<16x64xf32> to vector<16xf32>
    %43 = vector.shape_cast %42 : vector<16xf32> to vector<16x1xf32>
    %cst_13 = arith.constant 6.400000e+01 : f32
    %44 = vector.broadcast %cst_13 : f32 to vector<16x1xf32>
    %45 = arith.divf %43, %44 : vector<16x1xf32>
    %46 = vector.broadcast %45 : vector<16x1xf32> to vector<16x64xf32>
    %47 = arith.subf %41, %46 : vector<16x64xf32>
    %48 = arith.mulf %47, %47 : vector<16x64xf32>
    %cst_14 = arith.constant dense<0.000000e+00> : vector<16xf32>
    %49 = vector.multi_reduction <add>, %48, %cst_14 [1] : vector<16x64xf32> to vector<16xf32>
    %50 = vector.shape_cast %49 : vector<16xf32> to vector<16x1xf32>
    %cst_15 = arith.constant 6.400000e+01 : f32
    %51 = vector.broadcast %cst_15 : f32 to vector<16x1xf32>
    %52 = arith.divf %50, %51 : vector<16x1xf32>
    %53 = vector.broadcast %45 : vector<16x1xf32> to vector<16x64xf32>
    %54 = arith.subf %41, %53 : vector<16x64xf32>
    %cst_16 = arith.constant 9.99999974E-6 : f32
    %55 = vector.broadcast %cst_16 : f32 to vector<16x1xf32>
    %56 = arith.addf %52, %55 : vector<16x1xf32>
    %57 = math.rsqrt %56 : vector<16x1xf32>
    %58 = vector.broadcast %57 : vector<16x1xf32> to vector<16x64xf32>
    %59 = arith.mulf %54, %58 : vector<16x64xf32>
    %60 = vector.broadcast %2 : vector<1x64xf32> to vector<16x64xf32>
    %61 = arith.mulf %59, %60 : vector<16x64xf32>
    %62 = vector.broadcast %3 : vector<1x64xf32> to vector<16x64xf32>
    %63 = arith.addf %61, %62 : vector<16x64xf32>
    %cst_17 = arith.constant 0.000000e+00 : f32
    %64 = vector.broadcast %cst_17 : f32 to vector<16x64xf32>
    %65 = arith.maximumf %63, %64 : vector<16x64xf32>
    %66 = tpu.iota {dimensions = array<i32: 0>} : vector<16x64xi32>
    %c8_i32_18 = arith.constant 8 : i32
    %c0_i32_19 = arith.constant 0 : i32
    %67 = arith.cmpi eq, %c8_i32_18, %c0_i32_19 : i32
    %c1_i32_20 = arith.constant 1 : i32
    %68 = arith.select %67, %c1_i32_20, %c8_i32_18 : i32
    %69 = vector.broadcast %68 : i32 to vector<16x64xi32>
    %70 = arith.remsi %66, %69 : vector<16x64xi32>
    %c0_i32_21 = arith.constant 0 : i32
    %71 = vector.broadcast %c0_i32_21 : i32 to vector<16x64xi32>
    %72 = arith.cmpi ne, %70, %71 : vector<16x64xi32>
    %c0_i32_22 = arith.constant 0 : i32
    %73 = vector.broadcast %c0_i32_22 : i32 to vector<16x64xi32>
    %74 = arith.cmpi slt, %70, %73 : vector<16x64xi32>
    %c0_i32_23 = arith.constant 0 : i32
    %75 = arith.cmpi slt, %68, %c0_i32_23 : i32
    %76 = vector.broadcast %75 : i1 to vector<16x64xi1>
    %77 = vector.broadcast %76 : vector<16x64xi1> to vector<16x64xi1>
    %78 = arith.xori %74, %77 : vector<16x64xi1>
    %79 = arith.andi %78, %72 : vector<16x64xi1>
    %80 = vector.broadcast %68 : i32 to vector<16x64xi32>
    %81 = arith.addi %70, %80 : vector<16x64xi32>
    %82 = arith.select %79, %81, %70 : vector<16x64xi1>, vector<16x64xi32>
    %c0_i32_24 = arith.constant 0 : i32
    %83 = vector.broadcast %c0_i32_24 : i32 to vector<16x64xi32>
    %84 = arith.cmpi eq, %82, %83 : vector<16x64xi32>
    %c1_i32_25 = arith.constant 1 : i32
    %85 = tpu.dynamic_rotate %65 by %c1_i32_25 dim 0 : vector<16x64xf32>, i32 -> vector<16x64xf32>
    %cst_26 = arith.constant 0.000000e+00 : f32
    %86 = vector.broadcast %cst_26 : f32 to vector<16x64xf32>
    %87 = arith.select %84, %86, %85 : vector<16x64xi1>, vector<16x64xf32>
    %c7_i32_27 = arith.constant 7 : i32
    %88 = vector.broadcast %c7_i32_27 : i32 to vector<16x64xi32>
    %89 = arith.cmpi eq, %82, %88 : vector<16x64xi32>
    %c15_i32_28 = arith.constant 15 : i32
    %90 = tpu.dynamic_rotate %65 by %c15_i32_28 dim 0 : vector<16x64xf32>, i32 -> vector<16x64xf32>
    %cst_29 = arith.constant 0.000000e+00 : f32
    %91 = vector.broadcast %cst_29 : f32 to vector<16x64xf32>
    %92 = arith.select %89, %91, %90 : vector<16x64xi1>, vector<16x64xf32>
    %93 = tpu.concatenate %87, %65, %92 in 1 : vector<16x64xf32>, vector<16x64xf32>, vector<16x64xf32> -> vector<16x192xf32>
    %c0_30 = arith.constant 0 : index
    %c0_31 = arith.constant 0 : index
    %94 = vector.load %arg3[%c0_30, %c0_31] : memref<192x64xf32, #tpu.memory_space<vmem>>, vector<192x64xf32>
    %cst_32 = arith.constant dense<0.000000e+00> : vector<16x64xf32>
    %95 = tpu.matmul %93, %94, %cst_32 {dimension_numbers = #tpu.dot_dimension_numbers<[1], [0], [0], [1], [0, 0, 1, 1], [], []>} : vector<16x192xf32>, vector<192x64xf32>, vector<16x64xf32> -> vector<16x64xf32>
    %96 = vector.broadcast %4 : vector<1x64xf32> to vector<16x64xf32>
    %97 = arith.addf %95, %96 : vector<16x64xf32>
    %cst_33 = arith.constant dense<0.000000e+00> : vector<16xf32>
    %98 = vector.multi_reduction <add>, %97, %cst_33 [1] : vector<16x64xf32> to vector<16xf32>
    %99 = vector.shape_cast %98 : vector<16xf32> to vector<16x1xf32>
    %cst_34 = arith.constant 6.400000e+01 : f32
    %100 = vector.broadcast %cst_34 : f32 to vector<16x1xf32>
    %101 = arith.divf %99, %100 : vector<16x1xf32>
    %102 = vector.broadcast %101 : vector<16x1xf32> to vector<16x64xf32>
    %103 = arith.subf %97, %102 : vector<16x64xf32>
    %104 = arith.mulf %103, %103 : vector<16x64xf32>
    %cst_35 = arith.constant dense<0.000000e+00> : vector<16xf32>
    %105 = vector.multi_reduction <add>, %104, %cst_35 [1] : vector<16x64xf32> to vector<16xf32>
    %106 = vector.shape_cast %105 : vector<16xf32> to vector<16x1xf32>
    %cst_36 = arith.constant 6.400000e+01 : f32
    %107 = vector.broadcast %cst_36 : f32 to vector<16x1xf32>
    %108 = arith.divf %106, %107 : vector<16x1xf32>
    %109 = vector.broadcast %101 : vector<16x1xf32> to vector<16x64xf32>
    %110 = arith.subf %97, %109 : vector<16x64xf32>
    %cst_37 = arith.constant 9.99999974E-6 : f32
    %111 = vector.broadcast %cst_37 : f32 to vector<16x1xf32>
    %112 = arith.addf %108, %111 : vector<16x1xf32>
    %113 = math.rsqrt %112 : vector<16x1xf32>
    %114 = vector.broadcast %113 : vector<16x1xf32> to vector<16x64xf32>
    %115 = arith.mulf %110, %114 : vector<16x64xf32>
    %116 = vector.broadcast %5 : vector<1x64xf32> to vector<16x64xf32>
    %117 = arith.mulf %115, %116 : vector<16x64xf32>
    %118 = vector.broadcast %6 : vector<1x64xf32> to vector<16x64xf32>
    %119 = arith.addf %117, %118 : vector<16x64xf32>
    %cst_38 = arith.constant 0.000000e+00 : f32
    %120 = vector.broadcast %cst_38 : f32 to vector<16x64xf32>
    %121 = arith.maximumf %119, %120 : vector<16x64xf32>
    %cst_39 = arith.constant dense<0.000000e+00> : vector<1x16xf32>
    %122 = tpu.matmul %7, %121, %cst_39 {dimension_numbers = #tpu.dot_dimension_numbers<[1], [1], [0], [0], [0, 0, 1, 0], [], []>} : vector<1x64xf32>, vector<16x64xf32>, vector<1x16xf32> -> vector<1x16xf32>
    %123 = vector.broadcast %8 : vector<1x1xf32> to vector<1x16xf32>
    %124 = arith.addf %122, %123 : vector<1x16xf32>
    %cst_40 = arith.constant 0.000000e+00 : f32
    %125 = vector.broadcast %cst_40 : f32 to vector<1x16xf32>
    %126 = arith.maximumf %124, %125 : vector<1x16xf32>
    %c0_41 = arith.constant 0 : index
    %c0_42 = arith.constant 0 : index
    %127 = vector.load %arg5[%c0_41, %c0_42] : memref<1x16xf32, #tpu.memory_space<vmem>>, vector<1x16xf32>
    tpu.vector_store %arg5[%c0_41, %c0_42], %126 {strides = array<i32>} : memref<1x16xf32, #tpu.memory_space<vmem>>, vector<1x16xf32>,
    return
  }
  func.func @transform_0(%arg0: i32) -> (i32, i32) {
    %c0_i32 = arith.constant 0 : i32
    %c0_i32_0 = arith.constant 0 : i32
    %c0_i32_1 = arith.constant 0 : i32
    return %c0_i32, %c0_i32_0 : i32, i32
  }
  func.func @transform_1(%arg0: i32) -> (i32, i32) {
    %c0_i32 = arith.constant 0 : i32
    %c0_i32_0 = arith.constant 0 : i32
    %c0_i32_1 = arith.constant 0 : i32
    return %c0_i32, %c0_i32_0 : i32, i32
  }
  func.func @transform_2(%arg0: i32) -> (i32, i32) {
    %c0_i32 = arith.constant 0 : i32
    %c0_i32_0 = arith.constant 0 : i32
    %c0_i32_1 = arith.constant 0 : i32
    return %c0_i32, %c0_i32_0 : i32, i32
  }
  func.func @transform_3(%arg0: i32) -> (i32, i32) {
    %c0_i32 = arith.constant 0 : i32
    %c0_i32_0 = arith.constant 0 : i32
    %c0_i32_1 = arith.constant 0 : i32
    return %c0_i32, %c0_i32_0 : i32, i32
  }
  func.func @transform_4(%arg0: i32) -> (i32, i32) {
    %c0_i32 = arith.constant 0 : i32
    %c0_i32_0 = arith.constant 0 : i32
    %c0_i32_1 = arith.constant 0 : i32
    return %c0_i32, %c0_i32_0 : i32, i32
  }
}

</mosaic_0001>

<bundles_post_ra>
// kernel: tpu_custom_call.1
= control target key start
LH: loop header
LB: loop body
LE: loop exit
PB: predicated region body
PF: predicated region fallthrough
CT: control target
= control target key end

     0   :  { %v21_v2 = vlaneseq  ;;  %s663_s21 = smov 32   ;;  %s925_s0 = inlined_call_operand.vmem [shape: f32[16,32], index: 0, kind: input, shape index: {}]   ;;  %s926_s1 = inlined_call_operand.vmem [shape: f32[96,64], index: 1, kind: input, shape index: {}]   ;;  %s927_s2 = inlined_call_operand.vmem [shape: f32[192,64], index: 2, kind: input, shape index: {}]   ;;  %s928_s3 = inlined_call_operand.vmem [shape: f32[8,64], index: 3, kind: input, shape index: {}]   ;;  %s929_s4 = inlined_call_operand.hbm [shape: f32[1,16], index: 4, kind: output, shape index: {}]  }
   0x1   :  { %v19_v0 = vld [vmem:[%s925_s0] sm:$0xff]  ;;  %v20_v1 = vld [vmem:[%s925_s0 + $0x8] sm:$0xff]  ;;  %v90_v8 = vld [vmem:[%s926_s1 + $0x10] sm:$0xff] }
   0x2   :  { %v88_v3 = vld [vmem:[%s926_s1] sm:$0xff]  ;;  %68 = vrot.lane.b32.xlu0 %v19_v0, %s663_s21  ;;  %v50_v4 = vrot.slane %v19_v0, 7  ;;  %v59_v5 = vrot.slane %v19_v0, 1  ;;  %v60_v6 = vrot.slane %v20_v1, 1  ;;  %v89_v7 = vld [vmem:[%s926_s1 + $0x8] sm:$0xff]  ;;  %v91_v9 = vld [vmem:[%s926_s1 + $0x18] sm:$0xff] }
   0x3   :  { %v713_v10 = vshrl.u32 %v21_v2, 7  ;;  %v558_v11 = vpack.c.bf16 %v89_v7, %v88_v3  ;;  %v562_v12 = vpack.c.bf16 %v91_v9, %v90_v8  ;;  %v92_v13 = vld [vmem:[%s926_s1 + $0x20] sm:$0xff]  ;;  %v93_v14 = vld [vmem:[%s926_s1 + $0x28] sm:$0xff]  ;;  %v51_v15 = vrot.slane %v20_v1, 7 }
   0x4   :  { %v566_v19 = vpack.c.bf16 %v93_v14, %v92_v13 }
   0x5   :  { %v28_v16 = vand.u32 7, %v713_v10  ;;  %vm61_vm0 = vcmp.lt.s32.totalorder %v713_v10, 7  ;;  %v23_v17 = vadd.s32 8, %v713_v10  ;;  %559 = vmatprep.subr.bf16.mxu0 %v558_v11  ;;  %vm52_vm1 = vcmp.lt.s32.totalorder %v713_v10, 1 }
   0x6   :  { %v62_v18 = vsel %vm61_vm0, %v59_v5, %v60_v6  ;;  %70 = vrot.lane.b32.xlu0 %v20_v1, %s663_s21  ;;  %561 = vmatpush3.bf16.msra.mxu0 %v558_v11 }
   0x7   :  { %9 = vsyncpa [#allocation3], 0  ;;  %vm727_vm2 = vcmp.eq.s32.totalorder %v28_v16, 7  ;;  %v35_v21 = vand.u32 7, %v23_v17  ;;  %v63_v22 = vsel %vm61_vm0, %v60_v6, %v59_v5  ;;  %563 = vmatprep.subr.bf16.mxu0 %v562_v12  ;;  %v54_v23 = vsel %vm52_vm1, %v51_v15, %v50_v4  ;;  %v94_v25 = vld [vmem:[%s926_s1 + $0x30] sm:$0xff]  ;;  %v95_v26 = vld [vmem:[%s926_s1 + $0x38] sm:$0xff] }
   0x8   :  { %v64_v24 = vsel %vm727_vm2, 0.0, %v62_v18  ;;  %v53_v27 = vsel %vm52_vm1, %v50_v4, %v51_v15  ;;  %s664_s9 = smov 64   ;;  %v570_v30 = vpack.c.bf16 %v95_v26, %v94_v25  ;;  %v96_v31 = vld [vmem:[%s926_s1 + $0x40] sm:$0xff]  ;;  %v97_v32 = vld [vmem:[%s926_s1 + $0x48] sm:$0xff]  ;;  %v98_v34 = vld [vmem:[%s926_s1 + $0x50] sm:$0xff]  ;;  %vm765_vm4 = vcmp.eq.s32.totalorder %v28_v16, 0 }
   0x9   :  { %76 = vrot.lane.b32.xlu1 %v64_v24, %s664_s9  ;;  %vm746_vm3 = vcmp.eq.s32.totalorder %v35_v21, 7  ;;  %v574_v33 = vpack.c.bf16 %v97_v32, %v96_v31  ;;  %v99_v35 = vld [vmem:[%s926_s1 + $0x58] sm:$0xff]  ;;  %vm82_vm5 = vcmask 261120   ;;  %v55_v39 = vsel %vm765_vm4, 0.0, %v54_v23  ;;  %v783_v50 = vld [vmem:[%s928_s3] sm:$0xff]  ;;  %v250_v5 = vld [vmem:[%s927_s2 + $0x8] sm:$0xff] }
   0xa   :  { %v65_v29 = vsel %vm746_vm3, 0.0, %v63_v22  ;;  %565 = vmatpush3.bf16.msra.mxu0 %v562_v12  ;;  %v578_v36 = vpack.c.bf16 %v99_v35, %v98_v34  ;;  %vm771_vm6 = vcmp.eq.s32.totalorder %v35_v21, 0  ;;  %vm85_vm7 = vcmask 523264   ;;  %v249_v4 = vld [vmem:[%s927_s2] sm:$0xff]  ;;  %v251_v6 = vld [vmem:[%s927_s2 + $0x10] sm:$0xff]  ;;  %v252_v9 = vld [vmem:[%s927_s2 + $0x18] sm:$0xff] }
   0xb   :  { %567 = vmatprep.subr.bf16.mxu0 %v566_v19  ;;  %vm104_vm8 = vcmask 785408   ;;  %v56_v43 = vsel %vm771_vm6, 0.0, %v53_v27  ;;  %v102_v49 = vsub.s32 0, %v713_v10  ;;  %v665_v7 = vmov 0.0|0.0   ;;  %v253_v12 = vld [vmem:[%s927_s2 + $0x20] sm:$0xff]  ;;  %v254_v13 = vld [vmem:[%s927_s2 + $0x28] sm:$0xff]  ;;  %vm620_vm10 = vmpackc.low %vm85_vm7, %vm85_vm7 }
   0xc   :  { %582 = vmatprep.subr.bf16.mxu1 %v665_v7  ;;  %v583_v8 = vpack.c.bf16 %v250_v5, %v249_v4  ;;  %v586_v11 = vpack.c.bf16 %v252_v9, %v251_v6  ;;  %v589_v14 = vpack.c.bf16 %v254_v13, %v253_v12  ;;  %v255_v15 = vld [vmem:[%s927_s2 + $0x30] sm:$0xff]  ;;  %v256_v16 = vld [vmem:[%s927_s2 + $0x38] sm:$0xff]  ;;  %v257_v18 = vld [vmem:[%s927_s2 + $0x40] sm:$0xff]  ;;  %vm666_vm9 = vmmov 0  }
   0xd   :  { %78 = vrot.lane.b32.xlu1 %v65_v29, %s664_s9  ;;  %v103_v51 = vrot.slane %v783_v50, %v102_v49  ;;  %v592_v17 = vpack.c.bf16 %v256_v16, %v255_v15  ;;  %v259_v22 = vld [vmem:[%s927_s2 + $0x50] sm:$0xff]  ;;  %v260_v23 = vld [vmem:[%s927_s2 + $0x58] sm:$0xff]  ;;  %v261_v25 = vld [vmem:[%s927_s2 + $0x60] sm:$0xff]  ;;  %vm484_vm11 = vcmask 122880  }
   0xe   :  { %569 = vmatpush3.bf16.msra.mxu0 %v566_v19  ;;  %584 = vmatpush1.bf16.msra.mxu1 %v583_v8  ;;  %v258_v19 = vld [vmem:[%s927_s2 + $0x48] sm:$0xff]  ;;  %v598_v24 = vpack.c.bf16 %v260_v23, %v259_v22  ;;  %v263_v29 = vld [vmem:[%s927_s2 + $0x70] sm:$0xff]  ;;  %v265_v32 = vld [vmem:[%s927_s2 + $0x80] sm:$0xff] }
   0xf   :  { %571 = vmatprep.subr.bf16.mxu0 %v570_v30  ;;  %585 = vmatprep.subr.bf16.mxu1 %v665_v7  ;;  %v595_v21 = vpack.c.bf16 %v258_v19, %v257_v18  ;;  %v262_v26 = vld [vmem:[%s927_s2 + $0x68] sm:$0xff]  ;;  %v267_v35 = vld [vmem:[%s927_s2 + $0x90] sm:$0xff]  ;;  %v275_v19 = vsub.s32 3, %v713_v10 }
  0x10   :  { %v601_v27 = vpack.c.bf16 %v262_v26, %v261_v25 }
  0x11   :  { %v276_v37 = vrot.slane %v783_v50, %v275_v19 }
  0x12   :  { %573 = vmatpush3.bf16.msra.mxu0 %v570_v30  ;;  %587 = vmatpush1.bf16.msra.mxu1 %v586_v11  ;;  %v264_v30 = vld [vmem:[%s927_s2 + $0x78] sm:$0xff] }
  0x13   :  { %575 = vmatprep.subr.bf16.mxu0 %v574_v33  ;;  %588 = vmatprep.subr.bf16.mxu1 %v665_v7  ;;  %v604_v31 = vpack.c.bf16 %v264_v30, %v263_v29 }
  0x16   :  { %577 = vmatpush3.bf16.msra.mxu0 %v574_v33  ;;  %590 = vmatpush1.bf16.msra.mxu1 %v589_v14  ;;  %v266_v33 = vld [vmem:[%s927_s2 + $0x88] sm:$0xff] }
  0x17   :  { %579 = vmatprep.subr.bf16.mxu0 %v578_v36  ;;  %591 = vmatprep.subr.bf16.mxu1 %v665_v7  ;;  %v607_v34 = vpack.c.bf16 %v266_v33, %v265_v32 }
  0x1a   :  { %581 = vmatpush3.bf16.msra.mxu0 %v578_v36  ;;  %593 = vmatpush1.bf16.msra.mxu1 %v592_v17  ;;  %v268_v36 = vld [vmem:[%s927_s2 + $0x98] sm:$0xff] }
  0x1b   :  { %618 = vmatprep.subr.bf16.mxu0 %v665_v7  ;;  %594 = vmatprep.subr.bf16.mxu1 %v665_v7 }
  0x1e   :  { %596 = vmatpush1.bf16.msra.mxu1 %v595_v21 }
  0x1f   :  { %597 = vmatprep.subr.bf16.mxu1 %v665_v7 }
  0x22   :  { %599 = vmatpush1.bf16.msra.mxu1 %v598_v24 }
  0x23   :  { %600 = vmatprep.subr.bf16.mxu1 %v665_v7 }
  0x26   :  { %602 = vmatpush1.bf16.msra.mxu1 %v601_v27 }
  0x27   :  { %603 = vmatprep.subr.bf16.mxu1 %v665_v7 }
  0x2a   :  { %605 = vmatpush1.bf16.msra.mxu1 %v604_v31 }
  0x2b   :  { %606 = vmatprep.subr.bf16.mxu1 %v665_v7 }
  0x2e   :  { %608 = vmatpush1.bf16.msra.mxu1 %v607_v34 }
  0x2f   :  { %609 = vmatprep.subr.bf16.mxu1 %v665_v7 }
  0x74   :  { %v69_v38 = vpop.permute.xlu0 %68 }
  0x75   :  { %v83_v41 = vsel %vm82_vm5, %v55_v39, %v69_v38  ;;  %v610_v38 = vpack.c.bf16 %v268_v36, %v267_v35  ;;  %v269_v39 = vld [vmem:[%s927_s2 + $0xa0] sm:$0xff] }
  0x77   :  { %611 = vmatpush1.bf16.msra.mxu1 %v610_v38 }
  0x78   :  { %v71_v42 = vpop.permute.xlu0 %70  ;;  %612 = vmatprep.subr.bf16.mxu1 %v665_v7 }
  0x79   :  { %v84_v46 = vsel %vm82_vm5, %v56_v43, %v71_v42  ;;  %v271_v43 = vld [vmem:[%s927_s2 + $0xb0] sm:$0xff] }
  0x7b   :  { %v77_v44 = vpop.permute.xlu1 %76 }
  0x7c   :  { %v86_v45 = vsel %vm85_vm7, %v83_v41, %v77_v44  ;;  %v270_v41 = vld [vmem:[%s927_s2 + $0xa8] sm:$0xff]  ;;  %v272_v44 = vld [vmem:[%s927_s2 + $0xb8] sm:$0xff]  ;;  %s669_s2 = smov [#allocation2]  }
  0x7d   :  { %548 = vmatprep.mubr.msk.f32.mxu0 %vm104_vm8, %v86_v45  ;;  %v613_v42 = vpack.c.bf16 %v270_v41, %v269_v39  ;;  %v616_v45 = vpack.c.bf16 %v272_v44, %v271_v43  ;;  %v667_v39 = vmov 0.0   ;;  %v668_v41 = vmov 0  }
  0x7e   :  { %629 = vset.pattern.permute.xlu1 %v668_v41  ;;  %630 = vset.pattern.permute.xlu0 %v668_v41 }
  0x7f   :  { %v79_v47 = vpop.permute.xlu1 %78  ;;  %614 = vmatpush1.bf16.msra.mxu1 %v613_v42 }
  0x80   :  { %v87_v48 = vsel %vm85_vm7, %v84_v46, %v79_v47  ;;  %615 = vmatprep.subr.bf16.mxu1 %v665_v7 }
  0x81   :  { %549 = vmatmul.mubr.msk.f32.vlgmr.msra.gmra.mrb[0].mxu0 %vm104_vm8, %v87_v48 }
  0x82   :  { %555 = vmatprep.mubr.msk.f32.mxu0 %vm666_vm9, %v667_v39 }
  0x83   :  { %617 = vmatpush1.bf16.msra.mxu1 %v616_v45 }
 0x154   :  { %v550_v52 = vpop.f32.mrb[0].mxu0 }
 0x155   :  { %v183_v53 = vadd.f32 %v550_v52, %v103_v51  ;;  %v177_v54 = vpop.f32.mrb[1].mxu0 }
 0x156   :  { %v178_v55 = vadd.f32 %v177_v54, %v103_v51  ;;  %v221_v54 = vsub.s32 2, %v713_v10 }
 0x157   :  { %v189_v56 = vsel %vm85_vm7, %v183_v53, 0.0 }
 0x158   :  { %190 = vadd.xlane.f32.xlu1 %v189_v56  ;;  %v186_v57 = vsel %vm85_vm7, %v178_v55, 0.0 }
 0x159   :  { %187 = vadd.xlane.f32.xlu0 %v186_v57 }
 0x1e5   :  { %v191_v58 = vpop.xlane.xlu1 %190 }
 0x1e6   :  { %v194_v59 = vmul.f32 0.015625, %v191_v58  ;;  %v188_v60 = vpop.xlane.xlu0 %187  ;;  %v222_v58 = vrot.slane %v783_v50, %v221_v54 }
 0x1e7   :  { %v193_v61 = vmul.f32 0.015625, %v188_v60 }
 0x1e8   :  { %v788_v62 = vsub.f32 %v183_v53, %v194_v59  ;;  %v215_v53 = vsub.s32 1, %v713_v10 }
 0x1e9   :  { %v790_v63 = vsub.f32 %v178_v55, %v193_v61 }
 0x1ea   :  { %v198_v2 = vmul.f32 %v788_v62, %v788_v62  ;;  %v216_v55 = vrot.slane %v783_v50, %v215_v53 }
 0x1eb   :  { %v197_v0 = vmul.f32 %v790_v63, %v790_v63 }
 0x1ec   :  { %v202_v3 = vsel %vm85_vm7, %v198_v2, 0.0 }
 0x1ed   :  { %v199_v1 = vsel %vm85_vm7, %v197_v0, 0.0 }
 0x1ee   :  { %200 = vadd.xlane.f32.xlu0 %v199_v1 }
 0x1f2   :  { %203 = vadd.xlane.f32.xlu0 %v202_v3 }
 0x27b   :  { %v201_v46 = vpop.xlane.xlu0 %200 }
 0x27c   :  { %v205_v47 = vmul.f32 0.015625, %v201_v46 }
 0x27e   :  { %v207_v48 = vadd.f32 1e-05, %v205_v47 }
 0x27f   :  { %v204_v49 = vpop.xlane.xlu0 %203 }
 0x280   :  { %631 = vrsqrt.f32 %v207_v48  ;;  %v206_v51 = vmul.f32 0.015625, %v204_v49  ;;  %v386_v48 = vsub.s32 4, %v713_v10 }
 0x282   :  { %v208_v52 = vadd.f32 1e-05, %v206_v51  ;;  %v387_v49 = vrot.slane %v783_v50, %v386_v48  ;;  %v392_v51 = vsub.s32 5, %v713_v10 }
 0x284   :  { %633 = vrsqrt.f32 %v208_v52 }
 0x28a   :  { %v632_v56 = vpop.eup %631 }
 0x28b   :  { %v211_v57 = vmul.f32 %v632_v56, %v790_v63 }
 0x28d   :  { %v217_v59 = vmul.f32 %v216_v55, %v211_v57 }
 0x28e   :  { %v634_v60 = vpop.eup %633 }
 0x28f   :  { %v223_v61 = vadd.f32 %v222_v58, %v217_v59  ;;  %v212_v0 = vmul.f32 %v634_v60, %v788_v62 }
 0x291   :  { %v225_v1 = vmax.f32 %v223_v61, 0.0  ;;  %v218_v2 = vmul.f32 %v216_v55, %v212_v0  ;;  %v393_v55 = vrot.slane %v783_v50, %v392_v51 }
 0x293   :  { %241 = vrot.lane.b32.xlu1 %v225_v1, %s664_s9  ;;  %v224_v3 = vadd.f32 %v222_v58, %v218_v2  ;;  %v227_v5 = vrot.slane %v225_v1, 7  ;;  %v233_v7 = vrot.slane %v225_v1, 1  ;;  %v402_v2 = vrot.slane %v783_v50, 6 }
 0x295   :  { %v226_v4 = vmax.f32 %v224_v3, 0.0 }
 0x297   :  { %243 = vrot.lane.b32.xlu0 %v226_v4, %s664_s9  ;;  %v228_v6 = vrot.slane %v226_v4, 7  ;;  %v234_v8 = vrot.slane %v226_v4, 1  ;;  %s492_s9 = sshll.u32 %s669_s2, 4  ;;  %s493_s9 = int_to_ptr.vmem [resolvable:$true] %s492_s9 }
 0x298   :  { %s639_s12 = scalar_lea.vmem %s493_s9, 16  ;;  %s643_s13 = scalar_lea.vmem %s493_s9, 32 }
 0x299   :  { %v235_v63 = vsel %vm61_vm0, %v233_v7, %v234_v8  ;;  %v230_v9 = vsel %vm52_vm1, %v228_v6, %v227_v5  ;;  %v236_v62 = vsel %vm61_vm0, %v234_v8, %v233_v7  ;;  %v229_v11 = vsel %vm52_vm1, %v227_v5, %v228_v6  ;;  %p640_p0 = scmp.ne.s32.totalorder %s493_s9, %s639_s12  ;;  %p644_p1 = scmp.lt.s32.totalorder %s493_s9, %s493_s9 }
 0x29a   :  { %v237_v12 = vsel %vm727_vm2, 0.0, %v235_v63  ;;  %v231_v14 = vsel %vm765_vm4, 0.0, %v230_v9  ;;  %v238_v16 = vsel %vm746_vm3, 0.0, %v236_v62  ;;  %v232_v18 = vsel %vm771_vm6, 0.0, %v229_v11  ;;  %p645_p2 = scmp.lt.s32.totalorder %s643_s13, %s639_s12 }
 0x29b   :  { %502 = vmatprep.mubr.msk.f32.mxu1 %vm85_vm7, %v237_v12 }
 0x29c   :  { %p646_p3 = por %p645_p2, %p644_p1 }
 0x29e   :  { %p647_p4 = pnand %p646_p3, %p640_p0 }
 0x305   :  { %v242_v13 = vpop.permute.xlu1 %241 }
 0x306   :  { %v247_v15 = vsel %vm85_vm7, %v231_v14, %v242_v13 }
 0x307   :  { %348 = vmatmul.mubr.f32.vlgmr.msra.gmra.mrb[0].mxu1 %v247_v15 }
 0x308   :  { %503 = vmatprep.mubr.msk.f32.mxu1 %vm85_vm7, %v238_v16 }
 0x309   :  { %v244_v17 = vpop.permute.xlu0 %243 }
 0x30a   :  { %v248_v20 = vsel %vm85_vm7, %v232_v18, %v244_v17 }
 0x30b   :  { %353 = vmatmul.mubr.f32.gmra.mrb[2].mxu1 %v248_v20 }
 0x3da   :  { %v349_v21 = vpop.f32.mrb[0].mxu1 }
 0x3db   :  { %v350_v22 = vadd.f32 %v349_v21, %v276_v37  ;;  %v351_v23 = vpop.f32.mrb[1].mxu1 }
 0x3dd   :  { %v358_v24 = vsel %vm85_vm7, %v350_v22, 0.0 }
 0x3de   :  { %359 = vadd.xlane.f32.xlu1 %v358_v24  ;;  %v354_v28 = vpop.f32.mrb[2].mxu1 }
 0x3df   :  { %v355_v25 = vadd.f32 %v354_v28, %v276_v37  ;;  %v356_v26 = vpop.f32.mrb[3].mxu1 }
 0x3e1   :  { %v361_v27 = vsel %vm85_vm7, %v355_v25, 0.0 }
 0x3e2   :  { %362 = vadd.xlane.f32.xlu0 %v361_v27 }
 0x46b   :  { %v360_v40 = vpop.xlane.xlu1 %359 }
 0x46c   :  { %v364_v29 = vmul.f32 0.015625, %v360_v40 }
 0x46e   :  { %v366_v30 = vsub.f32 %v350_v22, %v364_v29 }
 0x46f   :  { %v363_v31 = vpop.xlane.xlu0 %362 }
 0x470   :  { %v365_v32 = vmul.f32 0.015625, %v363_v31  ;;  %v368_v33 = vmul.f32 %v366_v30, %v366_v30 }
 0x472   :  { %v367_v34 = vsub.f32 %v355_v25, %v365_v32  ;;  %v370_v35 = vsel %vm85_vm7, %v368_v33, 0.0 }
 0x473   :  { %371 = vadd.xlane.f32.xlu1 %v370_v35 }
 0x474   :  { %v369_v36 = vmul.f32 %v367_v34, %v367_v34 }
 0x476   :  { %v373_v38 = vsel %vm85_vm7, %v369_v36, 0.0 }
 0x477   :  { %374 = vadd.xlane.f32.xlu0 %v373_v38 }
 0x484   :  { %400 = vperm.xlu1 %629, %v783_v50  }
 0x500   :  { %v372_v42 = vpop.xlane.xlu1 %371 }
 0x501   :  { %v376_v43 = vmul.f32 0.015625, %v372_v42 }
 0x503   :  { %v378_v44 = vadd.f32 1e-05, %v376_v43 }
 0x504   :  { %v375_v45 = vpop.xlane.xlu0 %374  ;;  %v401_v10 = vpop.permute.xlu1 %400 }
 0x505   :  { %635 = vrsqrt.f32 %v378_v44  ;;  %v377_v46 = vmul.f32 0.015625, %v375_v45  ;;  %v403_v3 = vrot.slane %v401_v10, 7 }
 0x507   :  { %v379_v47 = vadd.f32 1e-05, %v377_v46 }
 0x509   :  { %637 = vrsqrt.f32 %v379_v47 }
 0x50f   :  { %v636_v52 = vpop.eup %635 }
 0x510   :  { %v382_v53 = vmul.f32 %v636_v52, %v366_v30 }
 0x512   :  { %v388_v54 = vmul.f32 %v387_v49, %v382_v53 }
 0x513   :  { %v638_v56 = vpop.eup %637 }
 0x514   :  { %v383_v57 = vmul.f32 %v638_v56, %v367_v34  ;;  %v394_v59 = vadd.f32 %v393_v55, %v388_v54 }
 0x516   :  { %v389_v58 = vmul.f32 %v387_v49, %v383_v57  ;;  %v396_v61 = vmax.f32 %v394_v59, 0.0 }
 0x518   :  { %v395_v60 = vadd.f32 %v393_v55, %v389_v58 }
 0x51a   :  { %v397_v0 = vmax.f32 %v395_v60, 0.0 }
 0x51c   :  { %v619_v1 = vpack.c.bf16 %v397_v0, %v396_v61 }
 0x51e   :  { %621 = vmatpush3.bf16.xpose.msk.msra.mxu0 %vm620_vm10, %v619_v1 }
 0x525   :  { %556 = vmatmul.mubr.msk.f32.vlgmr.msra.gmra.mrb[2].mxu0 %vm85_vm7, %v402_v2 }
 0x5f8   :  { %v479_v4 = vpop.f32.mrb[2].mxu0 }
 0x5f9   :  { %v480_v5 = vadd.f32 %v479_v4, %v403_v3  ;;  %v557_v6 = vpop.f32.mrb[3].mxu0 }
 0x5fb   :  { %v483_v7 = vmax.f32 %v480_v5, 0.0 }
 0x5fd   :  { %485 = vst.msk [vmem:[#allocation2] sm:$0x1] %vm484_vm11, %v483_v7 }
 0x5fe   :  { %650 = shalt.err (!%p647_p4)
}
 0x5ff   :  { %s651_s16 = scalar_lea.hbm %s929_s4, 16 }
 0x600   :  { %p652_p5 = scmp.ne.s32.totalorder %s929_s4, %s651_s16  ;;  %p655_p6 = scmp.lt.u32.totalorder %s651_s16, %s929_s4 }
 0x602   :  { %p657_p7 = pnand %p655_p6, %p652_p5 }
 0x604   :  { %660 = shalt.err (!%p657_p7)
}
 0x605   :  { %495 = dma.vmem_to_hbm [thread:$0]  %s493_s9, 16, %s929_s4, [#allocation3]  }
 0x606   :  { %661 = dma.done.wait [#allocation3], 16  }
 0x607   :  { %662 = vsyncadd [#allocation3], 4294967280 }
 0x608   :  { %499 = vsyncpa [#allocation3], 1 }

</bundles_post_ra>
